<compile_context>
chip_gen: v7x
topology: tpu7x:2x2x1
jax: 0.10.0
libtpu: 0.0.40
codegen_flags: <defaults>
</compile_context>

<pallas_src>
import functools

import jax
import jax.numpy as jnp
from jax.experimental import pallas as pl
from jax.experimental.pallas import tpu as pltpu

IGNORE_INDEX = -100
_MAX_V_CHUNK = 2048            # lanes per vocab chunk (multiple of 128)
_TARGET_BLOCK_BYTES = 2 << 20  # ~2 MiB logits block per grid step


def _round_up(x, m):
    return ((x + m - 1) // m) * m


def _cdiv(a, b):
    return (a + b - 1) // b


def _choose_tiles(n_rows, vocab, itemsize):
    """Pick (row_tile, v_chunk) targeting ~2 MiB logits blocks; safe on v5e/v6e/v7x."""
    v_chunk = vocab if vocab <= _MAX_V_CHUNK else _MAX_V_CHUNK
    rows = _TARGET_BLOCK_BYTES // (v_chunk * itemsize)
    rows = int(max(128, min(1024, rows)))
    rows -= rows % 128                      # keep a multiple of 128 (hence of 8)
    rows = min(rows, _round_up(n_rows, 8))  # don't exceed the (rounded) row count
    return rows, v_chunk


def _wce_kernel(labels_ref, logits_ref, ce_ref, m_ref, s_ref, t_ref, *, vocab_size):
    """Online logsumexp + target-logit gather over vocab chunks.

    labels_ref : (ROWS, 1)  int32   (padded rows carry IGNORE_INDEX)
    logits_ref : (ROWS, VC) f32/bf16
    ce_ref     : (ROWS, 1)  f32     output: logsumexp - target_logit
    m_ref/s_ref/t_ref : (ROWS, 1) f32 scratch (running max / sum-exp / target logit)
    """
    j = pl.program_id(1)

    @pl.when(j == 0)
    def _():
        m_ref[...] = jnp.full_like(m_ref, -jnp.inf)
        s_ref[...] = jnp.zeros_like(s_ref)
        t_ref[...] = jnp.zeros_like(t_ref)

    chunk = logits_ref.shape[1]
    x = logits_ref[...].astype(jnp.float32)                    # (ROWS, VC)
    lbl = labels_ref[...]                                      # (ROWS, 1) int32

    # Global vocab-column index for this chunk.
    col = jax.lax.broadcasted_iota(jnp.int32, x.shape, 1) + j * chunk

    # Mask out-of-vocab tail columns (only traced in when V is not a multiple of the chunk).
    if vocab_size % chunk != 0:
        x = jnp.where(col < vocab_size, x, -jnp.inf)

    # Online (streaming) logsumexp over vocab chunks.
    m_prev = m_ref[...]
    m_new = jnp.maximum(m_prev, jnp.max(x, axis=-1, keepdims=True))
    alpha = jnp.exp(m_prev - m_new)
    p = jnp.exp(x - m_new)
    s_ref[...] = alpha * s_ref[...] + jnp.sum(p, axis=-1, keepdims=True)
    m_ref[...] = m_new

    # Target-logit gather via boolean mask (no float one-hot materialized).
    # Labels outside [0, V) (other than ignore_index) never match; torch would raise.
    hit = col == lbl
    t_ref[...] += jnp.sum(jnp.where(hit, x, 0.0), axis=-1, keepdims=True)

    @pl.when(j == pl.num_programs(1) - 1)
    def _():
        ce_ref[...] = m_ref[...] + jnp.log(s_ref[...]) - t_ref[...]


@jax.jit
def weighted_cross_entropy_loss(logits, labels, weight_tensor):
    """logits: (B, S, V) float (f32 or bf16); labels: (B, S) int; weight_tensor: (V,) float."""
    B, S, V = logits.shape
    N = B * S

    flat_logits = logits.reshape(N, V)                 # no dtype change, no padding copy
    flat_labels = labels.reshape(N).astype(jnp.int32)

    row_tile, v_chunk = _choose_tiles(N, V, flat_logits.dtype.itemsize)
    n_row_tiles = _cdiv(N, row_tile)
    n_v_tiles = _cdiv(V, v_chunk)
    n_pad_rows = n_row_tiles * row_tile - N

    # Padding labels is O(N) int32 — cheap; tail logits rows are read OOB (garbage) and
    # masked out below because their padded labels are IGNORE_INDEX / their rows are sliced off.
    labels_col = flat_labels.reshape(N, 1)
    if n_pad_rows:
        labels_col = jnp.concatenate(
            [labels_col, jnp.full((n_pad_rows, 1), IGNORE_INDEX, jnp.int32)], axis=0)

    ce_padded = pl.pallas_call(
        functools.partial(_wce_kernel, vocab_size=V),
        out_shape=jax.ShapeDtypeStruct((n_row_tiles * row_tile, 1), jnp.float32),
        grid_spec=pltpu.PrefetchScalarGridSpec(
            num_scalar_prefetch=0,
            grid=(n_row_tiles, n_v_tiles),
            in_specs=[
                pl.BlockSpec((row_tile, 1), lambda i, j: (i, 0)),
                pl.BlockSpec((row_tile, v_chunk), lambda i, j: (i, j)),
            ],
            out_specs=pl.BlockSpec((row_tile, 1), lambda i, j: (i, 0)),
            scratch_shapes=[pltpu.VMEM((row_tile, 1), jnp.float32)] * 3,
        ),
        compiler_params=pltpu.CompilerParams(
            dimension_semantics=("parallel", "arbitrary")),  # rows shard across TCs; vocab is the reduction
    )(labels_col, flat_logits)

    ce = ce_padded[:N, 0]                               # raw per-token CE: logsumexp - target
    valid = flat_labels != IGNORE_INDEX
    safe = jnp.where(valid, flat_labels, 0)
    w_tok = jnp.where(valid, weight_tensor.astype(jnp.float32)[safe], 0.0)
    # NOTE: if every label is ignore_index the denominator is 0 and the result is nan,
    # matching torch.nn.CrossEntropyLoss behavior.
    return jnp.sum(jnp.where(valid, w_tok * ce, 0.0)) / jnp.sum(w_tok)


def build_weight_tensor(vocab_size, class_weights, ja_token_ids, nee_token_ids):
    """Mirror of WeightedCrossEntropyLoss.__init__ weight construction (tokenizer stand-in)."""
    # TODO(synk): tokenizer('ja'/'nee') token-id lookup has no Pallas equivalent; ids are given.
    w = jnp.ones((vocab_size,), dtype=jnp.float32)
    for t in ja_token_ids:
        if 0 <= t < vocab_size:
            w = w.at[t].set(class_weights[1])
    for t in nee_token_ids:
        if 0 <= t < vocab_size:
            w = w.at[t].set(class_weights[0])
    return w


def _reference_loss(logits, labels, weight_tensor):
    """Pure-JAX reference matching torch CrossEntropyLoss(weight, ignore_index, 'mean')."""
    B, S, V = logits.shape
    x = logits.reshape(-1, V).astype(jnp.float32)
    y = labels.reshape(-1)
    valid = y != IGNORE_INDEX
    safe_y = jnp.where(valid, y, 0)
    lse = jax.nn.logsumexp(x, axis=-1)
    tgt = jnp.take_along_axis(x, safe_y[:, None], axis=-1)[:, 0]
    w = weight_tensor[safe_y] * valid.astype(jnp.float32)
    return jnp.sum(w * (lse - tgt)) / jnp.sum(w)


def _run_case(key, B, S, V, dtype):
    k1, k2 = jax.random.split(key)
    logits = jax.random.normal(k1, (B, S, V), dtype=jnp.float32).astype(dtype)
    labels = jax.random.randint(k2, (B, S), 0, V, dtype=jnp.int32)
    # sprinkle in the weighted tokens and some ignored positions
    labels = labels.at[0, 0].set(7)
    labels = labels.at[0, 1].set(13)
    labels = labels.at[-1, 0].set(IGNORE_INDEX)
    labels = labels.at[-1, -1].set(IGNORE_INDEX)

    weight_tensor = build_weight_tensor(V, (2.0, 3.0), [7], [13])

    loss = weighted_cross_entropy_loss(logits, labels, weight_tensor)
    jax.block_until_ready(loss)

    ref = _reference_loss(logits, labels, weight_tensor)
    tol = 1e-5 if dtype == jnp.float32 else 1e-3
    assert jnp.allclose(loss, ref, rtol=tol, atol=tol), (B, S, V, str(dtype), loss, ref)


if __name__ == "__main__":
    key = jax.random.PRNGKey(0)
    k1, k2, k3 = jax.random.split(key, 3)
    _run_case(k1, 2, 8, 256, jnp.float32)     # small single-chunk case (module-consistent shapes)
    _run_case(k2, 4, 100, 2432, jnp.float32)  # multi vocab chunk + ragged vocab/row tails
    _run_case(k3, 2, 8, 256, jnp.bfloat16)    # bf16 logits pass-through (halved HBM read)
    print("KERNEL_OK")
</pallas_src>

<mosaic_0001>
module attributes {stable_mosaic.version = 11 : i64} {
  func.func @_wce_kernel(%arg0: i32, %arg1: i32, %arg2: memref<16x1xi32, #tpu.memory_space<vmem>>, %arg3: memref<16x256xf32, #tpu.memory_space<vmem>>, %arg4: memref<16x1xf32, #tpu.memory_space<vmem>>, %arg5: memref<16x1xf32, #tpu.memory_space<vmem>>, %arg6: memref<16x1xf32, #tpu.memory_space<vmem>>, %arg7: memref<16x1xf32, #tpu.memory_space<vmem>>) attributes {dimension_semantics = [#tpu.dimension_semantics<parallel>, #tpu.dimension_semantics<arbitrary>], iteration_bounds = array<i64: 1, 1>, scalar_prefetch = 0 : i64, scratch_operands = 3 : i64, tpu.core_type = #tpu.core_type<tc>, window_params = [{transform_indices = @transform_0, window_bounds = array<i64: 16, 1>}, {transform_indices = @transform_1, window_bounds = array<i64: 16, 256>}, {transform_indices = @transform_2, window_bounds = array<i64: 16, 1>}]} {
    %c0_i32 = arith.constant 0 : i32
    %0 = arith.cmpi eq, %arg1, %c0_i32 : i32
    %1 = arith.extui %0 : i1 to i32
    %c0_i32_0 = arith.constant 0 : i32
    %2 = arith.cmpi ne, %1, %c0_i32_0 : i32
    scf.if %2 {
      %cst_21 = arith.constant 0xFF800000 : f32
      %37 = vector.broadcast %cst_21 : f32 to vector<16x1xf32>
      %c0_22 = arith.constant 0 : index
      %c0_23 = arith.constant 0 : index
      %38 = vector.load %arg5[%c0_22, %c0_23] : memref<16x1xf32, #tpu.memory_space<vmem>>, vector<16x1xf32>
      tpu.vector_store %arg5[%c0_22, %c0_23], %37 {strides = array<i32>} : memref<16x1xf32, #tpu.memory_space<vmem>>, vector<16x1xf32>,
      %cst_24 = arith.constant 0.000000e+00 : f32
      %39 = vector.broadcast %cst_24 : f32 to vector<16x1xf32>
      %c0_25 = arith.constant 0 : index
      %c0_26 = arith.constant 0 : index
      %40 = vector.load %arg6[%c0_25, %c0_26] : memref<16x1xf32, #tpu.memory_space<vmem>>, vector<16x1xf32>
      tpu.vector_store %arg6[%c0_25, %c0_26], %39 {strides = array<i32>} : memref<16x1xf32, #tpu.memory_space<vmem>>, vector<16x1xf32>,
      %cst_27 = arith.constant 0.000000e+00 : f32
      %41 = vector.broadcast %cst_27 : f32 to vector<16x1xf32>
      %c0_28 = arith.constant 0 : index
      %c0_29 = arith.constant 0 : index
      %42 = vector.load %arg7[%c0_28, %c0_29] : memref<16x1xf32, #tpu.memory_space<vmem>>, vector<16x1xf32>
      tpu.vector_store %arg7[%c0_28, %c0_29], %41 {strides = array<i32>} : memref<16x1xf32, #tpu.memory_space<vmem>>, vector<16x1xf32>,
    } else {
    }
    %c0 = arith.constant 0 : index
    %c0_1 = arith.constant 0 : index
    %3 = vector.load %arg3[%c0, %c0_1] : memref<16x256xf32, #tpu.memory_space<vmem>>, vector<16x256xf32>
    %c0_2 = arith.constant 0 : index
    %c0_3 = arith.constant 0 : index
    %4 = vector.load %arg2[%c0_2, %c0_3] : memref<16x1xi32, #tpu.memory_space<vmem>>, vector<16x1xi32>
    %5 = tpu.iota {dimensions = array<i32: 1>} : vector<16x256xi32>
    %c256_i32 = arith.constant 256 : i32
    %6 = arith.muli %arg1, %c256_i32 : i32
    %7 = vector.broadcast %6 : i32 to vector<16x256xi32>
    %8 = arith.addi %5, %7 : vector<16x256xi32>
    %c0_4 = arith.constant 0 : index
    %c0_5 = arith.constant 0 : index
    %9 = vector.load %arg5[%c0_4, %c0_5] : memref<16x1xf32, #tpu.memory_space<vmem>>, vector<16x1xf32>
    %cst = arith.constant dense<0xFF800000> : vector<16xf32>
    %10 = vector.multi_reduction <maximumf>, %3, %cst [1] : vector<16x256xf32> to vector<16xf32>
    %11 = vector.shape_cast %10 : vector<16xf32> to vector<16x1xf32>
    %12 = arith.maximumf %9, %11 : vector<16x1xf32>
    %13 = arith.subf %9, %12 : vector<16x1xf32>
    %14 = math.exp %13 : vector<16x1xf32>
    %15 = vector.broadcast %12 : vector<16x1xf32> to vector<16x256xf32>
    %16 = arith.subf %3, %15 : vector<16x256xf32>
    %17 = math.exp %16 : vector<16x256xf32>
    %c0_6 = arith.constant 0 : index
    %c0_7 = arith.constant 0 : index
    %18 = vector.load %arg6[%c0_6, %c0_7] : memref<16x1xf32, #tpu.memory_space<vmem>>, vector<16x1xf32>
    %19 = arith.mulf %14, %18 : vector<16x1xf32>
    %cst_8 = arith.constant dense<0.000000e+00> : vector<16xf32>
    %20 = vector.multi_reduction <add>, %17, %cst_8 [1] : vector<16x256xf32> to vector<16xf32>
    %21 = vector.shape_cast %20 : vector<16xf32> to vector<16x1xf32>
    %22 = arith.addf %19, %21 : vector<16x1xf32>
    %c0_9 = arith.constant 0 : index
    %c0_10 = arith.constant 0 : index
    %23 = vector.load %arg6[%c0_9, %c0_10] : memref<16x1xf32, #tpu.memory_space<vmem>>, vector<16x1xf32>
    tpu.vector_store %arg6[%c0_9, %c0_10], %22 {strides = array<i32>} : memref<16x1xf32, #tpu.memory_space<vmem>>, vector<16x1xf32>,
    %c0_11 = arith.constant 0 : index
    %c0_12 = arith.constant 0 : index
    %24 = vector.load %arg5[%c0_11, %c0_12] : memref<16x1xf32, #tpu.memory_space<vmem>>, vector<16x1xf32>
    tpu.vector_store %arg5[%c0_11, %c0_12], %12 {strides = array<i32>} : memref<16x1xf32, #tpu.memory_space<vmem>>, vector<16x1xf32>,
    %25 = vector.broadcast %4 : vector<16x1xi32> to vector<16x256xi32>
    %26 = arith.cmpi eq, %8, %25 : vector<16x256xi32>
    %c0_13 = arith.constant 0 : index
    %c0_14 = arith.constant 0 : index
    %27 = vector.load %arg7[%c0_13, %c0_14] : memref<16x1xf32, #tpu.memory_space<vmem>>, vector<16x1xf32>
    %cst_15 = arith.constant 0.000000e+00 : f32
    %28 = vector.broadcast %cst_15 : f32 to vector<16x256xf32>
    %29 = arith.select %26, %3, %28 : vector<16x256xi1>, vector<16x256xf32>
    %cst_16 = arith.constant dense<0.000000e+00> : vector<16xf32>
    %30 = vector.multi_reduction <add>, %29, %cst_16 [1] : vector<16x256xf32> to vector<16xf32>
    %31 = vector.shape_cast %30 : vector<16xf32> to vector<16x1xf32>
    %32 = arith.addf %27, %31 : vector<16x1xf32>
    %c0_17 = arith.constant 0 : index
    %c0_18 = arith.constant 0 : index
    %33 = vector.load %arg7[%c0_17, %c0_18] : memref<16x1xf32, #tpu.memory_space<vmem>>, vector<16x1xf32>
    tpu.vector_store %arg7[%c0_17, %c0_18], %32 {strides = array<i32>} : memref<16x1xf32, #tpu.memory_space<vmem>>, vector<16x1xf32>,
    %c0_i32_19 = arith.constant 0 : i32
    %34 = arith.cmpi eq, %arg1, %c0_i32_19 : i32
    %35 = arith.extui %34 : i1 to i32
    %c0_i32_20 = arith.constant 0 : i32
    %36 = arith.cmpi ne, %35, %c0_i32_20 : i32
    scf.if %36 {
      %c0_21 = arith.constant 0 : index
      %c0_22 = arith.constant 0 : index
      %37 = vector.load %arg5[%c0_21, %c0_22] : memref<16x1xf32, #tpu.memory_space<vmem>>, vector<16x1xf32>
      %c0_23 = arith.constant 0 : index
      %c0_24 = arith.constant 0 : index
      %38 = vector.load %arg6[%c0_23, %c0_24] : memref<16x1xf32, #tpu.memory_space<vmem>>, vector<16x1xf32>
      %39 = math.log %38 : vector<16x1xf32>
      %40 = arith.addf %37, %39 : vector<16x1xf32>
      %c0_25 = arith.constant 0 : index
      %c0_26 = arith.constant 0 : index
      %41 = vector.load %arg7[%c0_25, %c0_26] : memref<16x1xf32, #tpu.memory_space<vmem>>, vector<16x1xf32>
      %42 = arith.subf %40, %41 : vector<16x1xf32>
      %c0_27 = arith.constant 0 : index
      %c0_28 = arith.constant 0 : index
      %43 = vector.load %arg4[%c0_27, %c0_28] : memref<16x1xf32, #tpu.memory_space<vmem>>, vector<16x1xf32>
      tpu.vector_store %arg4[%c0_27, %c0_28], %42 {strides = array<i32>} : memref<16x1xf32, #tpu.memory_space<vmem>>, vector<16x1xf32>,
    } else {
    }
    return
  }
  func.func @transform_0(%arg0: i32, %arg1: i32) -> (i32, i32) {
    %c0_i32 = arith.constant 0 : i32
    %c0_i32_0 = arith.constant 0 : i32
    return %arg0, %c0_i32 : i32, i32
  }
  func.func @transform_1(%arg0: i32, %arg1: i32) -> (i32, i32) {
    %c0_i32 = arith.constant 0 : i32
    return %arg0, %arg1 : i32, i32
  }
  func.func @transform_2(%arg0: i32, %arg1: i32) -> (i32, i32) {
    %c0_i32 = arith.constant 0 : i32
    %c0_i32_0 = arith.constant 0 : i32
    return %arg0, %c0_i32 : i32, i32
  }
}

</mosaic_0001>

<bundles_post_ra>
// kernel: weighted_cross_entropy_loss.1
= control target key start
LH: loop header
LB: loop body
LE: loop exit
PB: predicated region body
PF: predicated region fallthrough
CT: control target
= control target key end

     0   :  { %7 = vsyncpa [#allocation6], 0  ;;  %s202_s9 = smov [#allocation5]   ;;  %s271_s0 = inlined_call_operand.vmem [shape: s32[16,1], index: 0, kind: input, shape index: {}]   ;;  %s272_s1 = inlined_call_operand.hbm [shape: f32[16,256], index: 1, kind: input, shape index: {}]   ;;  %s273_s2 = inlined_call_operand.vmem [shape: f32[16,1], index: 2, kind: output, shape index: {}]  }
   0x1   :  { %s15_s10 = sshll.u32 %s202_s9, 4  ;;  %s178_s13 = scalar_lea.hbm %s272_s1, 512  ;;  %s16_s10 = int_to_ptr.vmem [resolvable:$true] %s15_s10 }
   0x2   :  { %p179_p0 = scmp.ne.s32.totalorder %s272_s1, %s178_s13  ;;  %p182_p1 = scmp.lt.u32.totalorder %s178_s13, %s272_s1 }
   0x4   :  { %p184_p2 = pnand %p182_p1, %p179_p0 }
   0x6   :  { %187 = shalt.err (!%p184_p2)
}
   0x7   :  { %s188_s18 = scalar_lea.vmem %s16_s10, 512  ;;  %p193_p4 = scmp.lt.s32.totalorder %s16_s10, %s16_s10 }
   0x8   :  { %p189_p3 = scmp.ne.s32.totalorder %s16_s10, %s188_s18  ;;  %p194_p5 = scmp.lt.s32.totalorder %s188_s18, %s188_s18 }
   0xa   :  { %p195_p6 = por %p194_p5, %p193_p4 }
   0xc   :  { %p196_p7 = pnand %p195_p6, %p189_p3 }
   0xe   :  { %199 = shalt.err (!%p196_p7)
}
   0xf   :  { %s203_s19 = smov 256   ;;  %s204_s20 = smov 16  }
  0x10   :  { %21 = dma.hbm_to_vmem [thread:$0]  %s272_s1, 512, %s16_s10, [#allocation6], %s203_s19, %s203_s19, %s204_s20  }
  0x11   :  { %200 = dma.done.wait [#allocation6], 512  }
  0x12   :  { %201 = vsyncadd [#allocation6], 4294966784  ;;  %vm29_vm0 = vcmask 7168   ;;  %v205_v0 = vmov -inf   ;;  %v36_v1 = vld [vmem:[#allocation5] sm:$0xff]  ;;  %v37_v2 = vld [vmem:[#allocation5 + $0x8] sm:$0xff]  ;;  %v42_v19 = vlaneseq }
  0x13   :  { %30 = vst.msk [vmem:[#allocation2] sm:$0xff] %vm29_vm0, %v205_v0  ;;  %31 = vst.msk [vmem:[#allocation2 + $0x8] sm:$0xff] %vm29_vm0, %v205_v0  ;;  %v237_v3 = vld [vmem:[#allocation5 + $0x10] sm:$0xff]  ;;  %v51_v4 = vmax.f32 %v36_v1, %v37_v2  ;;  %v239_v5 = vld [vmem:[#allocation5 + $0x18] sm:$0xff]  ;;  %v206_v7 = vmov 0   ;;  %v207_v8 = vmov 0.0  }
  0x14   :  { %v54_v6 = vmax.f32 %v237_v3, %v239_v5  ;;  %160 = vset.pattern.permute.xlu1 %v206_v7  ;;  %161 = vset.pattern.permute.xlu0 %v206_v7  ;;  %32 = vst.msk [vmem:[#allocation3] sm:$0xff] %vm29_vm0, %v207_v8  ;;  %33 = vst.msk [vmem:[#allocation3 + $0x8] sm:$0xff] %vm29_vm0, %v207_v8  ;;  %v40_v9 = vld [vmem:[%s271_s0] sm:$0xff]  ;;  %v41_v18 = vld [vmem:[%s271_s0 + $0x8] sm:$0xff]  ;;  %v43_v20 = vand.u32 127, %v42_v19 }
  0x15   :  { %52 = vmax.xlane.f32.xlu0 %v51_v4  ;;  %34 = vst.msk [vmem:[#allocation4] sm:$0xff] %vm29_vm0, %v207_v8  ;;  %35 = vst.msk [vmem:[#allocation4 + $0x8] sm:$0xff] %vm29_vm0, %v207_v8 }
  0x16   :  { %v44_v21 = vadd.s32 128, %v43_v20 }
  0x19   :  { %55 = vmax.xlane.f32.xlu0 %v54_v6 }
  0x1a   :  { %v49_v10 = vld [vmem:[#allocation2] sm:$0xff]  ;;  %v50_v13 = vld [vmem:[#allocation2 + $0x8] sm:$0xff] }
  0x1b   :  { %v87_v52 = vld [vmem:[#allocation3] sm:$0xff]  ;;  %v88_v56 = vld [vmem:[#allocation3 + $0x8] sm:$0xff] }
  0x1c   :  { %v114_v47 = vld [vmem:[#allocation4] sm:$0xff]  ;;  %v115_v61 = vld [vmem:[#allocation4 + $0x8] sm:$0xff] }
  0x2f   :  { %105 = vperm.xlu0 %161, %v40_v9  }
  0xa2   :  { %v53_v11 = vpop.xlane.xlu0 %52 }
  0xa3   :  { %v57_v12 = vmax.f32 %v49_v10, %v53_v11 }
  0xa5   :  { %v59_v14 = vsub.f32 %v49_v10, %v57_v12  ;;  %102 = vst.msk [vmem:[#allocation2] sm:$0xff] %vm29_vm0, %v57_v12  ;;  %67 = vperm.xlu1 %160, %v57_v12  }
  0xa6   :  { %v56_v15 = vpop.xlane.xlu0 %55 }
  0xa7   :  { %v58_v16 = vmax.f32 %v50_v13, %v56_v15  ;;  %v61_v49 = vmul.f32 1.442695, %v59_v14 }
  0xa9   :  { %v60_v17 = vsub.f32 %v50_v13, %v58_v16  ;;  %103 = vst.msk [vmem:[#allocation2 + $0x8] sm:$0xff] %vm29_vm0, %v58_v16  ;;  %72 = vperm.xlu1 %160, %v58_v16  }
  0xab   :  { %v63_v50 = vmul.f32 1.442695, %v60_v17 }
  0xac   :  { %v133_v4 = vld [vmem:[#allocation2] sm:$0xff] }
  0xad   :  { %108 = vperm.xlu1 %160, %v41_v18  }
  0xae   :  { %v106_v22 = vpop.permute.xlu0 %105 }
  0xaf   :  { %vm110_vm1 = vcmp.eq.s32.totalorder %v43_v20, %v106_v22  ;;  %vm111_vm2 = vcmp.eq.s32.totalorder %v44_v21, %v106_v22 }
  0xb0   :  { %v116_v23 = vsel %vm110_vm1, %v36_v1, 0.0  ;;  %v117_v24 = vsel %vm111_vm2, %v37_v2, 0.0  ;;  %v134_v10 = vld [vmem:[#allocation2 + $0x8] sm:$0xff] }
  0xb1   :  { %v120_v25 = vadd.f32 %v117_v24, %v116_v23 }
  0xb3   :  { %121 = vadd.xlane.f32.xlu0 %v120_v25 }
 0x124   :  { %v68_v26 = vpop.permute.xlu1 %67 }
 0x125   :  { %v75_v27 = vsub.f32 %v36_v1, %v68_v26  ;;  %v76_v28 = vsub.f32 %v37_v2, %v68_v26 }
 0x127   :  { %v79_v29 = vmul.f32 1.442695, %v75_v27  ;;  %v81_v30 = vmul.f32 1.442695, %v76_v28 }
 0x128   :  { %v73_v31 = vpop.permute.xlu1 %72 }
 0x129   :  { %162 = vpow2.f32 %v79_v29  ;;  %v77_v32 = vsub.f32 %v237_v3, %v73_v31  ;;  %v78_v33 = vsub.f32 %v239_v5, %v73_v31 }
 0x12a   :  { %164 = vpow2.f32 %v81_v30 }
 0x12b   :  { %v83_v34 = vmul.f32 1.442695, %v77_v32  ;;  %v85_v35 = vmul.f32 1.442695, %v78_v33 }
 0x12c   :  { %v109_v38 = vpop.permute.xlu1 %108 }
 0x12d   :  { %166 = vpow2.f32 %v83_v34  ;;  %vm112_vm3 = vcmp.eq.s32.totalorder %v43_v20, %v109_v38  ;;  %vm113_vm4 = vcmp.eq.s32.totalorder %v44_v21, %v109_v38 }
 0x12e   :  { %168 = vpow2.f32 %v85_v35  ;;  %v118_v43 = vsel %vm112_vm3, %v237_v3, 0.0  ;;  %v119_v44 = vsel %vm113_vm4, %v239_v5, 0.0 }
 0x12f   :  { %v123_v45 = vadd.f32 %v119_v44, %v118_v43  ;;  %170 = vpow2.f32 %v61_v49 }
 0x130   :  { %172 = vpow2.f32 %v63_v50 }
 0x133   :  { %v163_v36 = vpop.eup %162 }
 0x134   :  { %v165_v37 = vpop.eup %164 }
 0x135   :  { %v91_v39 = vadd.f32 %v165_v37, %v163_v36 }
 0x137   :  { %v167_v40 = vpop.eup %166  ;;  %92 = vadd.xlane.f32.xlu1 %v91_v39 }
 0x138   :  { %v169_v41 = vpop.eup %168 }
 0x139   :  { %v94_v42 = vadd.f32 %v169_v41, %v167_v40  ;;  %v171_v51 = vpop.eup %170 }
 0x13a   :  { %v89_v53 = vmul.f32 %v171_v51, %v87_v52  ;;  %v173_v54 = vpop.eup %172 }
 0x13b   :  { %95 = vadd.xlane.f32.xlu1 %v94_v42  ;;  %v90_v58 = vmul.f32 %v173_v54, %v88_v56 }
 0x13f   :  { %124 = vadd.xlane.f32.xlu1 %v123_v45 }
 0x140   :  { %v122_v46 = vpop.xlane.xlu0 %121 }
 0x141   :  { %v126_v48 = vadd.f32 %v122_v46, %v114_v47 }
 0x143   :  { %128 = vst.msk [vmem:[#allocation4] sm:$0xff] %vm29_vm0, %v126_v48 }
 0x14a   :  { %v143_v5 = vld [vmem:[#allocation4] sm:$0xff] }
 0x1c4   :  { %v93_v55 = vpop.xlane.xlu1 %92 }
 0x1c5   :  { %v97_v57 = vadd.f32 %v93_v55, %v89_v53 }
 0x1c7   :  { %100 = vst.msk [vmem:[#allocation3] sm:$0xff] %vm29_vm0, %v97_v57 }
 0x1c8   :  { %v96_v59 = vpop.xlane.xlu1 %95 }
 0x1c9   :  { %v98_v60 = vadd.f32 %v96_v59, %v90_v58 }
 0x1cb   :  { %101 = vst.msk [vmem:[#allocation3 + $0x8] sm:$0xff] %vm29_vm0, %v98_v60 }
 0x1cc   :  { %v125_v62 = vpop.xlane.xlu1 %124 }
 0x1cd   :  { %v127_v63 = vadd.f32 %v125_v62, %v115_v61 }
 0x1ce   :  { %v135_v0 = vld [vmem:[#allocation3] sm:$0xff] }
 0x1cf   :  { %174 = vlog2.f32 %v135_v0  ;;  %129 = vst.msk [vmem:[#allocation4 + $0x8] sm:$0xff] %vm29_vm0, %v127_v63 }
 0x1d2   :  { %v136_v1 = vld [vmem:[#allocation3 + $0x8] sm:$0xff] }
 0x1d3   :  { %176 = vlog2.f32 %v136_v1 }
 0x1d6   :  { %v144_v12 = vld [vmem:[#allocation4 + $0x8] sm:$0xff] }
 0x1d9   :  { %v175_v2 = vpop.eup %174 }
 0x1da   :  { %v138_v3 = vmul.f32 0.6931472, %v175_v2 }
 0x1dc   :  { %v141_v6 = vadd.f32 %v138_v3, %v133_v4 }
 0x1dd   :  { %v177_v7 = vpop.eup %176 }
 0x1de   :  { %v140_v8 = vmul.f32 0.6931472, %v177_v7  ;;  %v145_v9 = vsub.f32 %v141_v6, %v143_v5 }
 0x1e0   :  { %v142_v11 = vadd.f32 %v140_v8, %v134_v10  ;;  %147 = vst.msk [vmem:[%s273_s2] sm:$0xff] %vm29_vm0, %v145_v9 }
 0x1e2   :  { %v146_v13 = vsub.f32 %v142_v11, %v144_v12 }
 0x1e4   :  { %148 = vst.msk [vmem:[%s273_s2 + $0x8] sm:$0xff] %vm29_vm0, %v146_v13 }
 0x1e5   :  { %153 = vsyncpa [#allocation6], 1 }

</bundles_post_ra>
